<compile_context>
chip_gen: v7x
topology: tpu7x:2x2x1
jax: 0.10.0
libtpu: 0.0.40
codegen_flags: <defaults>
</compile_context>

<pallas_src>
import jax
import jax.numpy as jnp
from jax.experimental import pallas as pl
from jax.experimental.pallas import tpu as pltpu


def _round_up(x: int, m: int) -> int:
    return ((x + m - 1) // m) * m


def _pick_fold(K: int, N: int):
    """Smallest row-fold factor making both fold*K and fold*N multiples of 128."""
    for f in range(1, 129):
        if (f * K) % 128 == 0 and (f * N) % 128 == 0:
            return f
    return None


def _linear_kernel(x_ref, w_ref, b_ref, o_ref):
    # x_ref: (tm, Kf) compute_dtype, w_ref: (Kf, Nf) compute_dtype (block-diag),
    # b_ref: (1, Nf) f32, o_ref: (tm, Nf) out_dtype.
    # MXU matmul with f32 accumulation; bias add + cast stay in f32 (v5e-safe).
    acc = jnp.dot(x_ref[...], w_ref[...], preferred_element_type=jnp.float32)
    o_ref[...] = (acc + b_ref[...]).astype(o_ref.dtype)


def _pallas_folded_linear(x, w_bd, b_f, *, fold, K, N, compute_dtype, out_dtype):
    M = x.shape[0]
    Kf, Nf = fold * K, fold * N

    # Pad M only up to a multiple of `fold` (<= fold-1 rows, usually zero) so
    # the lane-fold reshape is a free contiguous reshape.  No K/N padding.
    Mp = _round_up(M, fold)
    xc = x.astype(compute_dtype)
    if Mp != M:
        xc = jnp.pad(xc, ((0, Mp - M), (0, 0)))
    rows = Mp // fold
    x_f = xc.reshape(rows, Kf)                       # free contiguous reshape

    # Row tile: multiple of 16 (bf16 sublane packing), big enough to amortize
    # the ~0.35us/step overhead, and sized so mid/large problems produce >= 2
    # grid steps (lets the "parallel" axis shard across v7x's 2 TensorCores).
    if rows <= 16:
        tm = rows                                    # == full dim -> legal block
    else:
        tm = max(16, min(1024, _round_up(pl.cdiv(rows, 2), 16)))
    grid = (pl.cdiv(rows, tm),)                      # partial last block OK

    in_bytes = jnp.dtype(compute_dtype).itemsize
    out_bytes = jnp.dtype(out_dtype).itemsize
    # 2x double-buffered x / out tiles + (conservatively double-buffered)
    # resident weight + bias, with 2x headroom; cap at 48 MiB so the request
    # is safe even on v7x's 64 MiB-per-TC VMEM (v5e/v6e have 128 MiB).
    need = (2 * tm * Kf * in_bytes + 2 * tm * Nf * out_bytes
            + 2 * Kf * Nf * in_bytes + 2 * Nf * 4)
    vmem_limit = int(min(48 * 1024 * 1024, max(4 * 1024 * 1024, 2 * need)))

    cost = pl.CostEstimate(                          # true (unpadded) sizes
        flops=2 * M * K * N,
        transcendentals=0,
        bytes_accessed=(M * K * in_bytes + K * N * in_bytes + N * 4
                        + M * N * out_bytes),
    )

    out_f = pl.pallas_call(
        _linear_kernel,
        out_shape=jax.ShapeDtypeStruct((rows, Nf), out_dtype),
        grid=grid,
        in_specs=[
            pl.BlockSpec((tm, Kf), lambda i: (i, 0)),    # x: tiled over rows
            pl.BlockSpec((Kf, Nf), lambda i: (0, 0)),    # weight: resident
            pl.BlockSpec((1, Nf), lambda i: (0, 0)),     # bias: resident
        ],
        out_specs=pl.BlockSpec((tm, Nf), lambda i: (i, 0)),
        compiler_params=pltpu.CompilerParams(
            dimension_semantics=("parallel",),           # no reduction axis
            vmem_limit_bytes=vmem_limit,
        ),
        cost_estimate=cost,
    )(x_f, w_bd, b_f)

    y = out_f.reshape(Mp, N)                         # free contiguous reshape
    if Mp != M:
        y = y[:M]                                    # tiny slice, rare path
    return y


def make_linear(w_t, b, *, fold=None, compute_dtype=jnp.bfloat16, out_dtype=None,
                force_pallas=False, flop_threshold=1 << 22):
    """Build the wrapped Linear module: y = x @ w_t + b.

    Folded (block-diagonal) parameters are precomputed ONCE here, hoisted out
    of the per-call path.  `fold` defaults to the smallest factor making the
    slab 128-lane dense (4 for a 32->32 linear); pass fold=8 to get 256-wide
    slabs matching the 256x256 MXU on v6e/v7x.  Pass out_dtype=jnp.bfloat16
    when the consumer accepts it to halve the output HBM stream, or
    compute_dtype=jnp.float32 for f32-exact results.
    """
    K, N = w_t.shape
    assert b.shape == (N,), (b.shape, N)
    if fold is None:
        fold = _pick_fold(K, N)
    if fold is None:
        # TODO(synk): shapes whose lane-fold never reaches a 128-lane multiple
        # fall back to plain XLA rather than a padded Pallas path.
        def apply(x):
            return (x @ w_t + b).astype(out_dtype or x.dtype)
        return apply

    Kf, Nf = fold * K, fold * N
    # Block-diagonal weight (fold copies of W on the diagonal) + tiled f32
    # bias, built once at module init.
    w_bd = jnp.kron(jnp.eye(fold, dtype=w_t.dtype), w_t).astype(compute_dtype)
    b_f = jnp.tile(b.astype(jnp.float32), fold).reshape(1, Nf)

    def apply(x):
        M = x.shape[0]
        odtype = out_dtype or x.dtype
        if not force_pallas and 2 * M * K * N < flop_threshold:
            # Tiny problem: a standalone Pallas launch is pure overhead.
            return (x @ w_t + b).astype(odtype)
        return _pallas_folded_linear(x, w_bd, b_f, fold=fold, K=K, N=N,
                                     compute_dtype=compute_dtype,
                                     out_dtype=odtype)

    return apply


class DummyWrapper:
    """Exact analogue of fme.core.stepper.DummyWrapper: pure delegation."""

    def __init__(self, module):
        self.module = module

    def __call__(self, *args, **kwargs):
        return self.module(*args, **kwargs)


if __name__ == "__main__":
    # Small shapes: batch=2, seq=8, hidden=32, out=32  ->  x: (16, 32)
    batch, seq, hidden, out_features = 2, 8, 32, 32
    key = jax.random.PRNGKey(0)
    kx, kw, kb = jax.random.split(key, 3)

    x = jax.random.normal(kx, (batch * seq, hidden), dtype=jnp.float32)
    # torch nn.Linear weight is (N, K); we store its transpose (K, N).
    w_t = jax.random.normal(kw, (hidden, out_features), dtype=jnp.float32) * 0.02
    b = jax.random.normal(kb, (out_features,), dtype=jnp.float32) * 0.02

    # Wrapped module; DummyWrapper just forwards to it.  force_pallas=True so
    # the Pallas kernel is exercised even at this toy size (normal use lets
    # `apply` fall back to XLA below the FLOP threshold).
    module = make_linear(w_t, b, force_pallas=True)
    wrapper = DummyWrapper(module)

    fwd = jax.jit(lambda a: wrapper(a))
    y = jax.block_until_ready(fwd(x))

    # Reference check against plain f32 JAX.  Inputs go through the MXU in
    # bf16 (f32 accumulation), so use a bf16-appropriate tolerance.
    y_ref = x @ w_t + b
    assert y.shape == (batch * seq, out_features), y.shape
    assert jnp.allclose(y, y_ref, atol=1e-2, rtol=1e-2), (
        float(jnp.max(jnp.abs(y - y_ref))))

    print("KERNEL_OK")
</pallas_src>

<mosaic_0001>
module attributes {stable_mosaic.version = 11 : i64} {
  func.func @_linear_kernel(%arg0: i32, %arg1: memref<4x128xbf16, #tpu.memory_space<vmem>>, %arg2: memref<128x128xbf16, #tpu.memory_space<vmem>>, %arg3: memref<1x128xf32, #tpu.memory_space<vmem>>, %arg4: memref<4x128xf32, #tpu.memory_space<vmem>>) attributes {dimension_semantics = [#tpu.dimension_semantics<parallel>], iteration_bounds = array<i64: 1>, scalar_prefetch = 0 : i64, scratch_operands = 0 : i64, tpu.core_type = #tpu.core_type<tc>, window_params = [{transform_indices = @transform_0, window_bounds = array<i64: 4, 128>}, {pipeline_mode = #tpu.pipeline_mode<synchronous>, transform_indices = @transform_1, window_bounds = array<i64: 128, 128>}, {pipeline_mode = #tpu.pipeline_mode<synchronous>, transform_indices = @transform_2, window_bounds = array<i64: 1, 128>}, {transform_indices = @transform_3, window_bounds = array<i64: 4, 128>}]} {
    %c0 = arith.constant 0 : index
    %c0_0 = arith.constant 0 : index
    %0 = vector.load %arg1[%c0, %c0_0] : memref<4x128xbf16, #tpu.memory_space<vmem>>, vector<4x128xbf16>
    %c0_1 = arith.constant 0 : index
    %c0_2 = arith.constant 0 : index
    %1 = vector.load %arg2[%c0_1, %c0_2] : memref<128x128xbf16, #tpu.memory_space<vmem>>, vector<128x128xbf16>
    %cst = arith.constant dense<0.000000e+00> : vector<4x128xf32>
    %2 = tpu.matmul %0, %1, %cst {dimension_numbers = #tpu.dot_dimension_numbers<[1], [0], [0], [1], [0, 0, 1, 1], [], []>} : vector<4x128xbf16>, vector<128x128xbf16>, vector<4x128xf32> -> vector<4x128xf32>
    %c0_3 = arith.constant 0 : index
    %c0_4 = arith.constant 0 : index
    %3 = vector.load %arg3[%c0_3, %c0_4] : memref<1x128xf32, #tpu.memory_space<vmem>>, vector<1x128xf32>
    %4 = vector.broadcast %3 : vector<1x128xf32> to vector<4x128xf32>
    %5 = arith.addf %2, %4 : vector<4x128xf32>
    %c0_5 = arith.constant 0 : index
    %c0_6 = arith.constant 0 : index
    %6 = vector.load %arg4[%c0_5, %c0_6] : memref<4x128xf32, #tpu.memory_space<vmem>>, vector<4x128xf32>
    tpu.vector_store %arg4[%c0_5, %c0_6], %5 {strides = array<i32>} : memref<4x128xf32, #tpu.memory_space<vmem>>, vector<4x128xf32>,
    return
  }
  func.func @transform_0(%arg0: i32) -> (i32, i32) {
    %c0_i32 = arith.constant 0 : i32
    %c0_i32_0 = arith.constant 0 : i32
    return %arg0, %c0_i32 : i32, i32
  }
  func.func @transform_1(%arg0: i32) -> (i32, i32) {
    %c0_i32 = arith.constant 0 : i32
    %c0_i32_0 = arith.constant 0 : i32
    %c0_i32_1 = arith.constant 0 : i32
    return %c0_i32, %c0_i32_0 : i32, i32
  }
  func.func @transform_2(%arg0: i32) -> (i32, i32) {
    %c0_i32 = arith.constant 0 : i32
    %c0_i32_0 = arith.constant 0 : i32
    %c0_i32_1 = arith.constant 0 : i32
    return %c0_i32, %c0_i32_0 : i32, i32
  }
  func.func @transform_3(%arg0: i32) -> (i32, i32) {
    %c0_i32 = arith.constant 0 : i32
    %c0_i32_0 = arith.constant 0 : i32
    return %arg0, %c0_i32 : i32, i32
  }
}

</mosaic_0001>

<bundles_post_ra>
// kernel: _lambda_.1
= control target key start
LH: loop header
LB: loop body
LE: loop exit
PB: predicated region body
PF: predicated region fallthrough
CT: control target
= control target key end

     0   :  { %8 = vsyncpa [#allocation3], 0  ;;  %s222_s12 = smov [#allocation2]   ;;  %s268_s0 = inlined_call_operand.vmem [shape: bf16[4,128], index: 0, kind: input, shape index: {}]   ;;  %s269_s1 = inlined_call_operand.hbm [shape: bf16[128,128], index: 1, kind: input, shape index: {}]   ;;  %s270_s2 = inlined_call_operand.vmem [shape: f32[1,128], index: 2, kind: input, shape index: {}]   ;;  %s271_s3 = inlined_call_operand.vmem [shape: f32[4,128], index: 3, kind: output, shape index: {}]  }
   0x1   :  { %s16_s13 = sshll.u32 %s222_s12, 4  ;;  %s198_s16 = scalar_lea.hbm %s269_s1, 1024  ;;  %s17_s13 = int_to_ptr.vmem [resolvable:$true] %s16_s13 }
   0x2   :  { %p199_p0 = scmp.ne.s32.totalorder %s269_s1, %s198_s16  ;;  %p202_p1 = scmp.lt.u32.totalorder %s198_s16, %s269_s1 }
   0x4   :  { %p204_p2 = pnand %p202_p1, %p199_p0 }
   0x6   :  { %207 = shalt.err (!%p204_p2)
}
   0x7   :  { %s208_s21 = scalar_lea.vmem %s17_s13, 1024  ;;  %p213_p4 = scmp.lt.s32.totalorder %s17_s13, %s17_s13 }
   0x8   :  { %p209_p3 = scmp.ne.s32.totalorder %s17_s13, %s208_s21  ;;  %p214_p5 = scmp.lt.s32.totalorder %s208_s21, %s208_s21 }
   0xa   :  { %p215_p6 = por %p214_p5, %p213_p4 }
   0xc   :  { %p216_p7 = pnand %p215_p6, %p209_p3 }
   0xe   :  { %219 = shalt.err (!%p216_p7)
}
   0xf   :  { %s223_s22 = smov 64   ;;  %s224_s23 = smov 4  }
  0x10   :  { %22 = dma.hbm_to_vmem [thread:$0]  %s269_s1, 1024, %s17_s13, [#allocation3], %s223_s22, %s223_s22, %s224_s23  }
  0x11   :  { %220 = dma.done.wait [#allocation3], 1024  }
  0x12   :  { %221 = vsyncadd [#allocation3], 4294966272  ;;  %v225_v0 = vmov 0.0   ;;  %vm226_vm0 = vmmov 0   ;;  %v190_v1 = vld [vmem:[#allocation2] sm:$0xff]   ;;  %v191_v2 = vld [vmem:[#allocation2 + $0x8] sm:$0xff]  }
  0x13   :  { %165 = vmatprep.subr.bf16.mxu0 %v225_v0  ;;  %181 = vmatprep.mubr.msk.bf16.mxu0 %vm226_vm0, %v225_v0  ;;  %v192_v3 = vld [vmem:[#allocation2 + $0x10] sm:$0xff]   ;;  %v193_v4 = vld [vmem:[#allocation2 + $0x18] sm:$0xff]   ;;  %v194_v5 = vld [vmem:[#allocation2 + $0x20] sm:$0xff]  }
  0x14   :  { %166 = vmatpush3.bf16.msra.mxu0 %v190_v1  ;;  %v195_v6 = vld [vmem:[#allocation2 + $0x28] sm:$0xff]   ;;  %v196_v7 = vld [vmem:[#allocation2 + $0x30] sm:$0xff]   ;;  %v197_v8 = vld [vmem:[#allocation2 + $0x38] sm:$0xff]  }
  0x15   :  { %167 = vmatprep.subr.bf16.mxu0 %v225_v0  ;;  %v29_v9 = vld [vmem:[%s268_s0] sm:$0x3] }
  0x16   :  { %v147_v10 = vld [vmem:[%s270_s2] ss:$0 sm:$0xff] }
  0x18   :  { %168 = vmatpush3.bf16.msra.mxu0 %v191_v2 }
  0x19   :  { %169 = vmatprep.subr.bf16.mxu0 %v225_v0 }
  0x1c   :  { %170 = vmatpush3.bf16.msra.mxu0 %v192_v3 }
  0x1d   :  { %171 = vmatprep.subr.bf16.mxu0 %v225_v0 }
  0x20   :  { %172 = vmatpush3.bf16.msra.mxu0 %v193_v4 }
  0x21   :  { %173 = vmatprep.subr.bf16.mxu0 %v225_v0 }
  0x24   :  { %174 = vmatpush3.bf16.msra.mxu0 %v194_v5 }
  0x25   :  { %175 = vmatprep.subr.bf16.mxu0 %v225_v0 }
  0x28   :  { %176 = vmatpush3.bf16.msra.mxu0 %v195_v6 }
  0x29   :  { %177 = vmatprep.subr.bf16.mxu0 %v225_v0 }
  0x2c   :  { %178 = vmatpush3.bf16.msra.mxu0 %v196_v7 }
  0x2d   :  { %179 = vmatprep.subr.bf16.mxu0 %v225_v0 }
  0x30   :  { %180 = vmatpush3.bf16.msra.mxu0 %v197_v8 }
  0x33   :  { %182 = vmatmul.mubr.bf16.vlgmr.msra.gmra.mrb[0].mxu0 %v29_v9 }
 0x106   :  { %v135_v11 = vpop.f32.mrb[0].mxu0 }
 0x107   :  { %v136_v12 = vadd.f32 %v147_v10, %v135_v11  ;;  %v183_v13 = vpop.f32.mrb[1].mxu0 }
 0x108   :  { %v138_v14 = vpop.f32.mrb[2].mxu0 }
 0x109   :  { %141 = vst [vmem:[%s271_s3] sm:$0xf] %v136_v12  ;;  %v184_v15 = vpop.f32.mrb[3].mxu0 }
 0x10a   :  { %146 = vsyncpa [#allocation3], 1 }

</bundles_post_ra>
